<compile_context>
chip_gen: v7x
topology: tpu7x:2x2x1
jax: 0.10.0
libtpu: 0.0.40
codegen_flags: <defaults>
</compile_context>

<pallas_src>
import jax
import jax.numpy as jnp
from jax.experimental import pallas as pl
from jax.experimental.pallas import tpu as pltpu

_LANE = 128


def _linear2x1_sigmoid_kernel(params_ref, x0_ref, x1_ref, o_ref):
    # params_ref: SMEM f32[3] = [w00, w01, b]
    # x0_ref / x1_ref / o_ref: VMEM f32[block_rows, 128] (batch mapped to lanes)
    w0 = params_ref[0]
    w1 = params_ref[1]
    b = params_ref[2]
    z = x0_ref[...] * w0 + x1_ref[...] * w1 + b
    o_ref[...] = jax.nn.sigmoid(z).astype(o_ref.dtype)


def linear_sigmoid(x, weight, bias, *, tile_rows=512, min_n_for_pallas=0):
    """sigmoid(x @ weight.T + bias) for a PyTorch-style Linear(2, 1).

    x:      [N, 2] float32
    weight: [1, 2] float32 (PyTorch layout)
    bias:   [1]    float32
    returns [N, 1] float32
    """
    n, f_in = x.shape
    f_out, f_in_w = weight.shape
    assert f_in == 2 and f_in_w == 2 and f_out == 1 and bias.shape == (1,)

    # For tiny batches the pallas_call launch + DMA setup dominates; let XLA
    # handle it directly (set min_n_for_pallas > 0 in production).
    if n < min_n_for_pallas:
        return jax.nn.sigmoid(x @ weight.T + bias)

    x = x.astype(jnp.float32)

    # --- lane-dense re-layout: batch -> [rows_pad, 128] ----------------------
    rows = -(-n // _LANE)                                   # ceil(n / 128)
    block_rows = max(8, (min(tile_rows, -(-rows // 8) * 8) // 8) * 8)
    rows_pad = -(-rows // block_rows) * block_rows
    n_pad = rows_pad * _LANE

    x_pad = jnp.pad(x, ((0, n_pad - n), (0, 0)))
    x0 = x_pad[:, 0].reshape(rows_pad, _LANE)               # feature 0, lane-dense
    x1 = x_pad[:, 1].reshape(rows_pad, _LANE)               # feature 1, lane-dense

    params = jnp.concatenate(
        [weight.reshape(-1).astype(jnp.float32),
         bias.reshape(-1).astype(jnp.float32)])             # [w00, w01, b]

    grid = (rows_pad // block_rows,)
    out = pl.pallas_call(
        _linear2x1_sigmoid_kernel,
        out_shape=jax.ShapeDtypeStruct((rows_pad, _LANE), jnp.float32),
        grid=grid,
        in_specs=[
            pl.BlockSpec(memory_space=pltpu.MemorySpace.SMEM),     # params (scalars)
            pl.BlockSpec((block_rows, _LANE), lambda i: (i, 0)),   # x[:, 0]
            pl.BlockSpec((block_rows, _LANE), lambda i: (i, 0)),   # x[:, 1]
        ],
        out_specs=pl.BlockSpec((block_rows, _LANE), lambda i: (i, 0)),
        compiler_params=pltpu.CompilerParams(
            dimension_semantics=("parallel",)),
    )(params, x0, x1)

    # Drop padding and restore the [N, 1] output of Linear(2, 1).
    return out.reshape(n_pad, 1)[:n]


if __name__ == "__main__":
    key = jax.random.PRNGKey(0)
    kx, kw, kb = jax.random.split(key, 3)

    # N not a multiple of 128 -> exercises padding; still "small" (~16 KiB).
    N, F_IN, F_OUT = 2000, 2, 1
    x = jax.random.normal(kx, (N, F_IN), dtype=jnp.float32)

    # Deterministic Linear(2, 1) parameters (torch-style uniform init).
    bound = 1.0 / (F_IN ** 0.5)
    weight = jax.random.uniform(kw, (F_OUT, F_IN), jnp.float32, -bound, bound)
    bias = jax.random.uniform(kb, (F_OUT,), jnp.float32, -bound, bound)

    # tile_rows=8 keeps blocks tiny for this small test while still producing
    # a multi-step, double-buffered grid (production default is 512 rows).
    out = linear_sigmoid(x, weight, bias, tile_rows=8)
    out = jax.block_until_ready(out)

    # Reference check in plain JAX.
    ref = jax.nn.sigmoid(x @ weight.T + bias)
    assert out.shape == (N, F_OUT)
    assert jnp.allclose(out, ref, atol=1e-5, rtol=1e-5), float(
        jnp.max(jnp.abs(out - ref)))

    print("KERNEL_OK")
</pallas_src>

<mosaic_0001>
module attributes {stable_mosaic.version = 11 : i64} {
  func.func @_linear2x1_sigmoid_kernel(%arg0: i32, %arg1: memref<3xf32, #tpu.memory_space<smem>>, %arg2: memref<8x128xf32, #tpu.memory_space<vmem>>, %arg3: memref<8x128xf32, #tpu.memory_space<vmem>>, %arg4: memref<8x128xf32, #tpu.memory_space<vmem>>) attributes {dimension_semantics = [#tpu.dimension_semantics<parallel>], iteration_bounds = array<i64: 2>, scalar_prefetch = 0 : i64, scratch_operands = 0 : i64, tpu.core_type = #tpu.core_type<tc>, window_params = [{transform_indices = @transform_0, window_bounds = array<i64: 3>}, {transform_indices = @transform_1, window_bounds = array<i64: 8, 128>}, {transform_indices = @transform_2, window_bounds = array<i64: 8, 128>}, {transform_indices = @transform_3, window_bounds = array<i64: 8, 128>}]} {
    %c0 = arith.constant 0 : index
    %0 = memref.load %arg1[%c0] : memref<3xf32, #tpu.memory_space<smem>>
    %c1 = arith.constant 1 : index
    %1 = memref.load %arg1[%c1] : memref<3xf32, #tpu.memory_space<smem>>
    %c2 = arith.constant 2 : index
    %2 = memref.load %arg1[%c2] : memref<3xf32, #tpu.memory_space<smem>>
    %c0_0 = arith.constant 0 : index
    %c0_1 = arith.constant 0 : index
    %3 = vector.load %arg2[%c0_0, %c0_1] : memref<8x128xf32, #tpu.memory_space<vmem>>, vector<8x128xf32>
    %4 = vector.broadcast %0 : f32 to vector<8x128xf32>
    %5 = arith.mulf %3, %4 : vector<8x128xf32>
    %c0_2 = arith.constant 0 : index
    %c0_3 = arith.constant 0 : index
    %6 = vector.load %arg3[%c0_2, %c0_3] : memref<8x128xf32, #tpu.memory_space<vmem>>, vector<8x128xf32>
    %7 = vector.broadcast %1 : f32 to vector<8x128xf32>
    %8 = arith.mulf %6, %7 : vector<8x128xf32>
    %9 = arith.addf %5, %8 : vector<8x128xf32>
    %10 = vector.broadcast %2 : f32 to vector<8x128xf32>
    %11 = arith.addf %9, %10 : vector<8x128xf32>
    %12 = arith.negf %11 : vector<8x128xf32>
    %13 = math.exp %12 : vector<8x128xf32>
    %cst = arith.constant 1.000000e+00 : f32
    %14 = vector.broadcast %cst : f32 to vector<8x128xf32>
    %15 = arith.addf %14, %13 : vector<8x128xf32>
    %16 = arith.divf %14, %15 : vector<8x128xf32>
    %c0_4 = arith.constant 0 : index
    %c0_5 = arith.constant 0 : index
    %17 = vector.load %arg4[%c0_4, %c0_5] : memref<8x128xf32, #tpu.memory_space<vmem>>, vector<8x128xf32>
    tpu.vector_store %arg4[%c0_4, %c0_5], %16 {strides = array<i32>} : memref<8x128xf32, #tpu.memory_space<vmem>>, vector<8x128xf32>,
    return
  }
  func.func @transform_0(%arg0: i32) -> i32 {
    %c0_i32 = arith.constant 0 : i32
    %c0_i32_0 = arith.constant 0 : i32
    return %c0_i32 : i32
  }
  func.func @transform_1(%arg0: i32) -> (i32, i32) {
    %c0_i32 = arith.constant 0 : i32
    %c0_i32_0 = arith.constant 0 : i32
    return %arg0, %c0_i32 : i32, i32
  }
  func.func @transform_2(%arg0: i32) -> (i32, i32) {
    %c0_i32 = arith.constant 0 : i32
    %c0_i32_0 = arith.constant 0 : i32
    return %arg0, %c0_i32 : i32, i32
  }
  func.func @transform_3(%arg0: i32) -> (i32, i32) {
    %c0_i32 = arith.constant 0 : i32
    %c0_i32_0 = arith.constant 0 : i32
    return %arg0, %c0_i32 : i32, i32
  }
}

</mosaic_0001>

<bundles_post_ra>
// kernel: tpu_custom_call.1
= control target key start
LH: loop header
LB: loop body
LE: loop exit
PB: predicated region body
PF: predicated region fallthrough
CT: control target
= control target key end

     0   :  { %8 = vsyncpa [#allocation5], 0  ;;  %s872_s0 = inlined_call_operand.hbm [shape: f32[3], index: 0, kind: input, shape index: {}]   ;;  %s873_s1 = inlined_call_operand.hbm [shape: f32[16,128], index: 1, kind: input, shape index: {}]   ;;  %s874_s2 = inlined_call_operand.hbm [shape: f32[16,128], index: 2, kind: input, shape index: {}]   ;;  %s875_s3 = inlined_call_operand.hbm [shape: f32[16,128], index: 3, kind: output, shape index: {}]  }
   0x1   :  { %9 = vsyncpa [#allocation3], 0 }
   0x2   :  { %11 = vsyncpa [#allocation3 + $0x1], 0 }
   0x3   :  { %12 = vsyncpa [#allocation8], 0 }
   0x4   :  { %14 = vsyncpa [#allocation8 + $0x1], 0 }
   0x5   :  { %15 = vsyncpa [#allocation4], 0 }
   0x6   :  { %17 = vsyncpa [#allocation4 + $0x1], 0  ;;  %s632_s12 = smov 0   ;;  %s634_s13 = smov 0  }
   0x7   :  { %s636_s14 = smov 0   ;;  %s638_s15 = smov 0  }
   0x8 LB: > { %s653_s16 = sadd.s32 4294967295, %s606_s15   ;;  %s373_s17 = sadd.s32 4294967294, %s606_s15   ;;  %s606_s15 = sphi %s638_s15, %s897_s15   ;;  %s602_s14 = sphi %s636_s14, %s896_s14   ;;  %s598_s13 = sphi %s634_s13, %s895_s13   ;;  %s594_s12 = sphi %s632_s12, %s894_s12  }
   0x9   : > { %s657_s18 = sadd.s32 1, %s606_s15   ;;  %s51_s19 = sadd.s32 1, %s602_s14 }
   0xa   : > { %s48_s20 = ssub.s32 %s606_s15, %s657_s18  ;;  %p58_p0 = scmp.ne.s32.totalorder %s602_s14, %s598_s13 }
   0xb   : > { %p49_p1 = scmp.eq.s32.totalorder %s48_s20, 0  ;;  %p64_p2 = scmp.ne.s32.totalorder %s598_s13, %s594_s12 }
   0xc   : > { %p876_p3 = scmp.eq.s32.totalorder %s653_s16, 0  ;;  %p114_p4 = scmp.eq.s32.totalorder %s653_s16, 1 }
   0xd   : > { %s669_s21 = scalar_select %p49_p1, %s602_s14, %s51_s19  }
   0xe   : > { %p673_p5 = por %p876_p3, %p64_p2  ;;  %p680_p6 = por %p114_p4, %p58_p0 }
   0xf   : > { %p120_p7 = scmp.eq.s32.totalorder %s373_s17, 1  ;;  %p374_p8 = scmp.ge.s32.totalorder %s606_s15, 1 }
  0x10   : > { %s880_s22 = scalar_select %p673_p5, 1, 0 }
  0x11   : > { %s881_s23 = scalar_select %p680_p6, 1, 0 }
  0x12   : > { %p127_p9 = scmp.lt.s32.totalorder %s606_s15, 3  ;;  %p686_p10 = por %p120_p7, %p64_p2 }
  0x13   : > { %p59_p13 = scmp.eq.s32.totalorder %s606_s15, 0  ;;  %p419_p1 = scmp.lt.s32.totalorder %s606_s15, 2 }
  0x14   : > { %s882_s24 = scalar_select %p686_p10, 1, 0 }
  0x15   : > { %p690_p11 = pnand %p374_p8, %p127_p9  ;;  %s700_s26 = sand.u32 1, %s602_s14  }
  0x16   : > { %p705_p3 = por %p59_p13, %p58_p0  ;;  %p885_p2 = scmp.eq.s32.totalorder %s653_s16, 0 }
  0x17   : > { %s883_s25 = scalar_select %p690_p11, 1, 0 }
  0x18   : > { %p403_p4 = pneg %p690_p11  ;;  %s377_s28 = sshll.u32 %s700_s26, 3 }
  0x19   : > { %s378_s29 = sshll.u32 %s606_s15, 7  ;;  %s459_s8 = scalar_lea.hbm %s872_s0, 16 }
  0x1a   : > { %p404_p7 = pnand %p403_p4, %p885_p2  ;;  %s718_s5 = scalar_lea.hbm %s873_s1, %s378_s29 }
  0x1b   : > { %p460_p0 = scmp.ne.s32.totalorder %s872_s0, %s459_s8  ;;  %p466_p4 = scmp.lt.u32.totalorder %s459_s8, %s872_s0 }
  0x1c   : > { %p461_p8 = pneg %p404_p7 }
  0x1e   : > { %p462_p9 = pnand %p461_p8, %p460_p0 }
  0x20   : > { %p463_p13 = pneg %p462_p9 }
  0x22   : > { %p468_p2 = pnand %p466_p4, %p463_p13 }
  0x24   : > { %471 = shalt.err (!%p468_p2)
}
  0x25   : > { %s608_s19 = smov [#allocation2]   ;;  %s153_s4 = scalar_lea.vmem [#allocation6], %s377_s28 }
  0x26   : > { %406 = dma.hbm_to_smem (!%p404_p7), %s872_s0, 16, %s608_s19, [#allocation5]  }
  0x27   : > { %s160_s6 = sshll.u32 %s153_s4, 4  ;;  %p738_p0 = pnand %p419_p1, %p705_p3  ;;  %s742_s6 = int_to_ptr.vmem [resolvable:$true] %s160_s6 }
  0x28   : > { %s150_s8 = scalar_lea.sflag [#allocation3], %s700_s26  ;;  %s472_s9 = scalar_lea.hbm %s718_s5, 128 }
  0x29   : > { %p473_p8 = scmp.ne.s32.totalorder %s718_s5, %s472_s9  ;;  %p474_p9 = pneg %p738_p0 }
  0x2a   : > { %s477_s11 = scalar_lea.hbm %s873_s1, 256  ;;  %p478_p3 = scmp.lt.u32.totalorder %s718_s5, %s873_s1 }
  0x2b   : > { %p475_p7 = pnand %p474_p9, %p473_p8  ;;  %p479_p1 = scmp.lt.u32.totalorder %s477_s11, %s472_s9 }
  0x2c   : > { %p481_p2 = scmp.lt.u32.totalorder %s472_s9, %s718_s5 }
  0x2d   : > { %p476_p13 = pneg %p475_p7  ;;  %p480_p4 = por %p479_p1, %p478_p3 }
  0x2f   : > { %p482_p12 = por %p481_p2, %p480_p4 }
  0x31   : > { %p483_p10 = pnand %p482_p12, %p476_p13 }
  0x33   : > { %486 = shalt.err (!%p483_p10)
}
  0x34   : > { %s487_s20 = scalar_lea.vmem %s742_s6, 128  ;;  %s609_s30 = smov [#allocation6]  }
  0x35   : > { %p488_p8 = scmp.ne.s32.totalorder %s742_s6, %s487_s20  ;;  %s492_s4 = sshll.u32 %s609_s30, 4  ;;  %s493_s4 = int_to_ptr.vmem [resolvable:$false] %s492_s4 }
  0x36   : > { %s494_s10 = scalar_lea.vmem %s493_s4, 256  ;;  %p495_p5 = scmp.lt.s32.totalorder %s742_s6, %s493_s4 }
  0x37   : > { %p490_p7 = pnand %p488_p8, %p474_p9  ;;  %p496_p3 = scmp.lt.s32.totalorder %s494_s10, %s487_s20 }
  0x39   : > { %p491_p6 = pneg %p490_p7  ;;  %p497_p1 = por %p496_p3, %p495_p5 }
  0x3b   : > { %p498_p4 = pnand %p497_p1, %p491_p6 }
  0x3d   : > { %501 = shalt.err (!%p498_p4)
}
  0x3e   : > { %410 = dma.hbm_to_vmem [thread:$0]  (!%p738_p0), %s718_s5, 128, %s742_s6, %s150_s8  }
  0x3f   : > { %s775_s11 = scalar_lea.hbm %s874_s2, %s378_s29  ;;  %s171_s17 = scalar_lea.vmem [#allocation7], %s377_s28 }
  0x40   : > { %s178_s19 = sshll.u32 %s171_s17, 4  ;;  %s168_s20 = scalar_lea.sflag [#allocation8], %s700_s26  ;;  %s179_s19 = int_to_ptr.vmem [resolvable:$true] %s178_s19 }
  0x41   : > { %s502_s30 = scalar_lea.hbm %s775_s11, 128  ;;  %s507_s29 = scalar_lea.hbm %s874_s2, 256 }
  0x42   : > { %p503_p5 = scmp.ne.s32.totalorder %s775_s11, %s502_s30  ;;  %p508_p12 = scmp.lt.u32.totalorder %s775_s11, %s874_s2 }
  0x43   : > { %p509_p13 = scmp.lt.u32.totalorder %s507_s29, %s502_s30  ;;  %p511_p8 = scmp.lt.u32.totalorder %s502_s30, %s775_s11 }
  0x44   : > { %p505_p6 = pnand %p503_p5, %p474_p9 }
  0x45   : > { %p510_p2 = por %p509_p13, %p508_p12 }
  0x46   : > { %p506_p10 = pneg %p505_p6 }
  0x47   : > { %p512_p7 = por %p511_p8, %p510_p2 }
  0x49   : > { %p513_p3 = pnand %p512_p7, %p506_p10 }
  0x4b   : > { %516 = shalt.err (!%p513_p3)
}
  0x4c   : > { %s517_s26 = scalar_lea.vmem %s179_s19, 128  ;;  %s610_s28 = smov [#allocation7]  }
  0x4d   : > { %p518_p1 = scmp.ne.s32.totalorder %s179_s19, %s517_s26  ;;  %s522_s10 = sshll.u32 %s610_s28, 4  ;;  %s523_s10 = int_to_ptr.vmem [resolvable:$false] %s522_s10 }
  0x4e   : > { %s524_s9 = scalar_lea.vmem %s523_s10, 256  ;;  %p525_p6 = scmp.lt.s32.totalorder %s179_s19, %s523_s10 }
  0x4f   : > { %p520_p4 = pnand %p518_p1, %p474_p9  ;;  %p526_p11 = scmp.lt.s32.totalorder %s524_s9, %s517_s26 }
  0x51   : > { %p521_p5 = pneg %p520_p4  ;;  %p527_p12 = por %p526_p11, %p525_p6 }
  0x53   : > { %p528_p13 = pnand %p527_p12, %p521_p5 }
  0x55   : > { %531 = shalt.err (!%p528_p13)
}
  0x56   : > { %413 = dma.hbm_to_vmem [thread:$0]  (!%p738_p0), %s775_s11, 128, %s179_s19, %s168_s20  }
  0x57   : > { %p887_p10 = scmp.ne.s32.totalorder %s883_s25, 0 }
  0x58   : > { %p888_p2 = scmp.eq.s32.totalorder (!%p887_p10), %s653_s16, 0 }
  0x59   : > { %187 = sbr.rel (%p887_p10) target bundleno = 158 (0x9e), region = 32 }
  0x60   : > { %577 = dma.done.wait (%p888_p2), [#allocation5], 16   ;;  %p889_p9 = pmov %p888_p2 }
  0x61   : > { %s806_s27 = sand.u32 1, %s598_s13   ;;  %p890_p11 = scmp.ne.s32.totalorder %s880_s22, 0 }
  0x62   : > { %579 = vsyncadd (%p889_p9), [#allocation5], 4294967280  ;;  %s809_s17 = sshll.u32 %s806_s27, 3  ;;  %s194_s7 = scalar_lea.sflag [#allocation3], %s806_s27 }
  0x63   : > { %s197_s11 = scalar_lea.vmem [#allocation6], %s809_s17 }
  0x64   : > { %581 = dma.done.wait (%p890_p11), %s194_s7, 128  }
  0x65   : > { %583 = vsyncadd (%p890_p11), %s194_s7, 4294967168  ;;  %s203_s25 = scalar_lea.sflag [#allocation8], %s806_s27  ;;  %s206_s19 = scalar_lea.vmem [#allocation7], %s809_s17 }
  0x66   : > { %585 = dma.done.wait (%p890_p11), %s203_s25, 128  }
  0x67   : > { %587 = vsyncadd (%p890_p11), %s203_s25, 4294967168 }
  0x68   : > { %211 = sfence }
  0x69   : > { %s235_s20 = sld [smem:[#allocation2]]  ;;  %s386_s30 = sld [smem:[#allocation2 + $0x1]]  ;;  %v238_v0 = vld [vmem:[%s197_s11] sm:$0xff]  ;;  %v241_v1 = vld [vmem:[%s206_s19] sm:$0xff] }
  0x6a   : > { %s387_s5 = sld [smem:[#allocation2 + $0x2]]  ;;  %s234_s22 = scalar_lea.vmem [#allocation9], %s809_s17 }
  0x6b   : > { %s268_s6 = sshll.u32 %s234_s22, 4  ;;  %s390_s29 = sshll.u32 %s653_s16, 7  ;;  %s825_s6 = int_to_ptr.vmem [resolvable:$true] %s268_s6 }
  0x6c   : > { %s830_s26 = scalar_lea.hbm %s875_s3, %s390_s29  ;;  %s255_s28 = scalar_lea.sflag [#allocation4], %s806_s27 }
  0x6d   : > { %s532_s10 = scalar_lea.vmem %s825_s6, 128  ;;  %p891_p8 = scmp.ne.s32.totalorder %s881_s23, 0 }
  0x6e   : > { %p533_p0 = scmp.ne.s32.totalorder %s825_s6, %s532_s10  ;;  %s611_s9 = smov [#allocation9]  }
  0x6f   : > { %v239_v2 = vstv %s235_s20  ;;  %v242_v4 = vstv %s386_s30  ;;  %s536_s16 = sshll.u32 %s611_s9, 4  ;;  %s537_s16 = int_to_ptr.vmem [resolvable:$false] %s536_s16 }
  0x70   : > { %v240_v3 = vmul.f32 %v239_v2, %v238_v0  ;;  %v243_v5 = vmul.f32 %v242_v4, %v241_v1  ;;  %v245_v6 = vstv %s387_s5  ;;  %p534_p7 = pnand %p533_p0, %p891_p8  ;;  %s538_s17 = scalar_lea.vmem %s537_s16, 256 }
  0x71   : > { %p539_p1 = scmp.lt.s32.totalorder %s825_s6, %s537_s16  ;;  %p540_p4 = scmp.lt.s32.totalorder %s538_s17, %s532_s10 }
  0x72   : > { %v244_v7 = vadd.f32 %v243_v5, %v240_v3  ;;  %p535_p3 = pneg %p534_p7 }
  0x73   : > { %p541_p5 = por %p540_p4, %p539_p1 }
  0x74   : > { %v246_v8 = vadd.f32 %v245_v6, %v244_v7 }
  0x75   : > { %p542_p6 = pnand %p541_p5, %p535_p3 }
  0x76   : > { %v388_v9 = vmul.f32 -1.442695, %v246_v8 }
  0x78   : > { %455 = vpow2.f32 %v388_v9 }
  0x82   : > { %v456_v10 = vpop.eup %455 }
  0x83   : > { %v250_v11 = vadd.f32 1.0, %v456_v10 }
  0x85   : > { %457 = vrcp.f32 %v250_v11 }
  0x8f   : > { %v458_v12 = vpop.eup %457 }
  0x90   : > { %253 = vst [vmem:[%s234_s22] sm:$0xff] %v458_v12 }
  0x91   : > { %545 = shalt.err (!%p542_p6)
}
  0x92   : > { %s546_s27 = scalar_lea.hbm %s830_s26, 128  ;;  %s550_s25 = scalar_lea.hbm %s875_s3, 256 }
  0x93   : > { %p547_p12 = scmp.ne.s32.totalorder %s830_s26, %s546_s27  ;;  %p551_p2 = scmp.lt.u32.totalorder %s830_s26, %s875_s3 }
  0x94   : > { %p552_p9 = scmp.lt.u32.totalorder %s550_s25, %s546_s27  ;;  %p554_p0 = scmp.lt.u32.totalorder %s546_s27, %s830_s26 }
  0x95   : > { %p548_p13 = pnand %p547_p12, %p891_p8 }
  0x96   : > { %p553_p11 = por %p552_p9, %p551_p2 }
  0x97   : > { %p549_p10 = pneg %p548_p13 }
  0x98   : > { %p555_p7 = por %p554_p0, %p553_p11 }
  0x9a   : > { %p556_p3 = pnand %p555_p7, %p549_p10 }
  0x9c   : > { %559 = shalt.err (!%p556_p3)
}
  0x9d   : > { %401 = dma.vmem_to_hbm [thread:$0]  (%p891_p8), %s825_s6, 128, %s830_s26, %s255_s28  }
  0x9e PF: > { %s280_s30 = sand.u32 1, %s594_s12   ;;  %p892_p1 = scmp.ne.s32.totalorder %s882_s24, 0 }
  0x9f   : > { %p893_p4 = scmp.ge.s32.totalorder %s606_s15, 2  ;;  %s281_s5 = scalar_lea.sflag [#allocation4], %s280_s30 }
  0xa1   : > { %p415_p5 = pnand %p893_p4, %p892_p1 }
  0xa3   : > { %589 = dma.done.wait (!%p415_p5), %s281_s5, 128  }
  0xa4   : > { %591 = vsyncadd (!%p415_p5), %s281_s5, 4294967168  ;;  %p20_p6 = scmp.ge.s32.totalorder %s657_s18, 4   ;;  %s894_s12 = smov %s598_s13 }
  0xa5   : > { %s895_s13 = smov %s602_s14  ;;  %s896_s14 = smov %s669_s21 }
  0xa6   : > { %s897_s15 = smov %s657_s18  ;;  %22 = sbr.rel (!%p20_p6) target bundleno = 8 (0x8), region = 95 }
  0xad   :  { %286 = vsyncpa [#allocation3], 1 }
  0xae   :  { %288 = vsyncpa [#allocation3 + $0x1], 1 }
  0xaf   :  { %289 = vsyncpa [#allocation8], 1 }
  0xb0   :  { %291 = vsyncpa [#allocation8 + $0x1], 1 }
  0xb1   :  { %292 = vsyncpa [#allocation4], 1 }
  0xb2   :  { %294 = vsyncpa [#allocation4 + $0x1], 1 }
  0xb3   :  { %295 = vsyncpa [#allocation5], 1 }
  0xb4   :  { %297 = vsyncpa [#allocation5 + $0x1], 1 }

</bundles_post_ra>
